<compile_context>
chip_gen: v7x
topology: tpu7x:2x2x1
jax: 0.10.0
libtpu: 0.0.40
codegen_flags: <defaults>
</compile_context>

<pallas_src>
import numpy as np
import jax
import jax.numpy as jnp
from jax.experimental import pallas as pl
from jax.experimental.pallas import tpu as pltpu

# ---------------- problem sizes (small, consistent with the module) -------------
BS = 2            # batch size
M = 4             # num_agent
U = 2             # args.num_user
D = 8             # per-user feature width
UD = U * D        # = 16
F0 = UD           # x0 / edge_attr feature dim (node_feature_size)
FL = UD           # x_last feature dim
CC = 4            # conv1 = Conv2d(2, CC, kernel_size=1) output channels
H1 = 64           # mlp1 hidden
DEMB = 32         # mlp1 output (edge embedding size)
H2 = 64           # mlp2 hidden
DOUT = 16         # mlp2 output
LAYER_IDX = 2     # layer_idx > 1 branch (uses x_last)

# directed fully-connected edge_idx without self loops: edge_idx[:,0]=src, [:,1]=dst
EDGES = np.array([(i, j) for i in range(M) for j in range(M) if i != j], dtype=np.int32)
E = EDGES.shape[0]
SRC = EDGES[:, 0]
DST = EDGES[:, 1]

# ------------------------- weight-slab row layout (static) ----------------------
SLAB_W = 64                        # lane width = max(CC*UD, H1, H2)
ROW_CONV = 0                       # rows 0..2 : conv bcast rows (w[:,0], w[:,1], bias)
ROW_W1 = 8                         # rows 8..87   : w1  [CC*UD+FL, H1] = [80, 64]
ROW_W2 = ROW_W1 + CC * UD + FL     # rows 88..151 : w2  [H1, DEMB]     = [64, 32]
ROW_W3 = ROW_W2 + H1               # rows 152..215: w3  [F0+FL+DEMB,H2]= [64, 64]
ROW_W4 = ROW_W3 + (F0 + FL + DEMB) # rows 216..279: w4  [H2, DOUT]     = [64, 16]
ROW_B = ROW_W4 + H2                # rows 280..283: b1, b2, b3, b4
SLAB_ROWS = ((ROW_B + 4 + 7) // 8) * 8   # 288


# -------------------------- init-time packing helpers ----------------------------
def pack_params(params):
    """Pack all weights/biases into one f32 [SLAB_ROWS, 64] VMEM slab (done once)."""
    wconv, bconv, w1, b1, w2, b2, w3, b3, w4, b4 = params
    slab = np.zeros((SLAB_ROWS, SLAB_W), dtype=np.float32)
    wconv = np.asarray(wconv); bconv = np.asarray(bconv)
    # conv1 broadcast rows: col index c*UD + k -> per-channel scalar
    slab[ROW_CONV + 0, :CC * UD] = np.repeat(wconv[:, 0], UD)
    slab[ROW_CONV + 1, :CC * UD] = np.repeat(wconv[:, 1], UD)
    slab[ROW_CONV + 2, :CC * UD] = np.repeat(bconv, UD)
    slab[ROW_W1:ROW_W1 + CC * UD + FL, :H1] = np.asarray(w1)
    slab[ROW_W2:ROW_W2 + H1, :DEMB] = np.asarray(w2)
    slab[ROW_W3:ROW_W3 + F0 + FL + DEMB, :H2] = np.asarray(w3)
    slab[ROW_W4:ROW_W4 + H2, :DOUT] = np.asarray(w4)
    slab[ROW_B + 0, :H1] = np.asarray(b1)
    slab[ROW_B + 1, :DEMB] = np.asarray(b2)
    slab[ROW_B + 2, :H2] = np.asarray(b3)
    slab[ROW_B + 3, :DOUT] = np.asarray(b4)
    return jnp.asarray(slab)


def build_topology(bb):
    """Static one-hot gather / aggregation matrices for a block of `bb` batches."""
    g = np.zeros((bb * E, bb * M), dtype=np.float32)    # node_j = g @ x0_flat
    at = np.zeros((bb * M, bb * E), dtype=np.float32)   # agg    = at @ emb
    for b in range(bb):
        for e in range(E):
            g[b * E + e, b * M + SRC[e]] = 1.0
            at[b * M + DST[e], b * E + e] = 1.0
    return jnp.asarray(g), jnp.asarray(at)


# -------------------------------- Pallas kernel ----------------------------------
def igconv_kernel(x0_ref, xl_ref, ea_ref, g_ref, at_ref, ws_ref, out_ref):
    f32 = jnp.float32
    x0 = x0_ref[...]            # [BB*M, F0]
    xl = xl_ref[...]            # [BB*M, FL]
    ea = ea_ref[...]            # [BB*E, F0]
    g = g_ref[...]              # [BB*E, BB*M]  one-hot(src), block-diag over batch
    at = at_ref[...]            # [BB*M, BB*E]  one-hot(dst)^T (link_to_agent sums)

    # static slices of the packed weight slab (free ref views, tiny loads)
    cw0 = ws_ref[ROW_CONV + 0:ROW_CONV + 1, :]              # [1, CC*UD]
    cw1 = ws_ref[ROW_CONV + 1:ROW_CONV + 2, :]
    cb = ws_ref[ROW_CONV + 2:ROW_CONV + 3, :]
    w1 = ws_ref[ROW_W1:ROW_W1 + CC * UD + FL, :]            # [80, H1]
    w2 = ws_ref[ROW_W2:ROW_W2 + H1, 0:DEMB]                 # [H1, DEMB]
    w3 = ws_ref[ROW_W3:ROW_W3 + F0 + FL + DEMB, :]          # [64, H2]
    w4 = ws_ref[ROW_W4:ROW_W4 + H2, 0:DOUT]                 # [H2, DOUT]
    b1 = ws_ref[ROW_B + 0:ROW_B + 1, :]                     # [1, H1]
    b2 = ws_ref[ROW_B + 1:ROW_B + 2, 0:DEMB]                # [1, DEMB]
    b3 = ws_ref[ROW_B + 2:ROW_B + 3, :]                     # [1, H2]
    b4 = ws_ref[ROW_B + 3:ROW_B + 4, 0:DOUT]                # [1, DOUT]

    # source-node gather as a matmul against the static one-hot (exact in f32)
    node_j = jnp.dot(g, x0, preferred_element_type=f32)     # [BB*E, F0]
    state_j = jnp.dot(g, xl, preferred_element_type=f32)    # [BB*E, FL]

    # conv1: 1x1 Conv2d(2, CC) over (node_j, edge_attr) as per-channel VPU FMAs.
    # output layout matches y.view(n, -1): col = c*UD + (u*D + d)
    nj_t = jnp.concatenate([node_j] * CC, axis=-1)          # [BB*E, CC*UD]
    ea_t = jnp.concatenate([ea] * CC, axis=-1)              # [BB*E, CC*UD]
    y = jnp.maximum(cw0 * nj_t + cw1 * ea_t + cb, 0.0)      # [BB*E, CC*UD]

    # mlp1: Linear(80->H1) -> ReLU -> Linear(H1->DEMB) on concat([y, state_j])
    lf = jnp.concatenate([y, state_j], axis=-1)             # [BB*E, CC*UD+FL]
    h = jnp.maximum(jnp.dot(lf, w1, preferred_element_type=f32) + b1, 0.0)
    emb = jnp.dot(h, w2, preferred_element_type=f32) + b2   # [BB*E, DEMB]

    # propagate: per-agent sum over incoming edges
    agg = jnp.dot(at, emb, preferred_element_type=f32)      # [BB*M, DEMB]

    # update_embedding: mlp2 on concat([x0, x_last, agg])
    zin = jnp.concatenate([x0, xl, agg], axis=-1)           # [BB*M, F0+FL+DEMB]
    z = jnp.maximum(jnp.dot(zin, w3, preferred_element_type=f32) + b3, 0.0)
    out = jnp.dot(z, w4, preferred_element_type=f32) + b4   # [BB*M, DOUT]
    out_ref[...] = out.astype(out_ref.dtype)


# ------------------------------ wrapper (thin glue) --------------------------------
def igconv_forward(x0, x_last, edge_attr, slab, gmat, amat, *, batch_block=None):
    bs = x0.shape[0]
    bb = bs if batch_block is None else batch_block   # batches per grid step
    assert bs % bb == 0
    nb = bs // bb
    # with nb > 1 blocks the (8,128) rule needs sublane-aligned row blocks
    assert nb == 1 or ((bb * M) % 8 == 0 and (bb * E) % 8 == 0)
    rm, re = bb * M, bb * E

    x0_flat = x0.reshape(bs * M, F0)
    xl_flat = x_last.reshape(bs * M, FL)
    ea_flat = edge_attr.reshape(bs * E, F0)

    out = pl.pallas_call(
        igconv_kernel,
        out_shape=jax.ShapeDtypeStruct((bs * M, DOUT), jnp.float32),
        grid=(nb,),
        in_specs=[
            pl.BlockSpec((rm, F0), lambda b: (b, 0)),        # x0 (flattened)
            pl.BlockSpec((rm, FL), lambda b: (b, 0)),        # x_last
            pl.BlockSpec((re, F0), lambda b: (b, 0)),        # edge_attr
            pl.BlockSpec(gmat.shape, lambda b: (0, 0)),      # gather one-hot
            pl.BlockSpec(amat.shape, lambda b: (0, 0)),      # aggregation one-hot^T
            pl.BlockSpec(slab.shape, lambda b: (0, 0)),      # packed weight slab
        ],
        out_specs=pl.BlockSpec((rm, DOUT), lambda b: (b, 0)),
        compiler_params=pltpu.CompilerParams(dimension_semantics=("parallel",)),
    )(x0_flat, xl_flat, ea_flat, gmat, amat, slab)
    return out.reshape(bs, M, DOUT)


# --------------------------- plain-JAX reference ----------------------------------
def igconv_reference(x0, x_last, edge_attr, params):
    wconv, bconv, w1, b1, w2, b2, w3, b3, w4, b4 = params
    bs = x0.shape[0]
    node_j = x0[:, SRC, :]
    state_j = x_last[:, SRC, :]
    n = bs * E
    # local_embedding
    xcat = jnp.concatenate([node_j.reshape(n, U, D), edge_attr.reshape(n, U, D)], axis=1)
    xconv = xcat.reshape(n, 2, U, D)
    y = jax.nn.relu(jnp.einsum('niuk,ci->ncuk', xconv, wconv) + bconv[None, :, None, None])
    lf = jnp.concatenate([y.reshape(n, -1), state_j.reshape(n, -1)], axis=-1)
    h = jax.nn.relu(lf @ w1 + b1)
    emb = (h @ w2 + b2).reshape(bs, E, DEMB)
    # propagate (per-agent sum of incoming edges)
    onehot = jax.nn.one_hot(jnp.asarray(DST), M, dtype=emb.dtype)
    agg = jnp.einsum('bed,em->bmd', emb, onehot)
    # update_embedding
    aggcat = jnp.concatenate([x0, x_last, agg], axis=-1).reshape(bs * M, -1)
    z = jax.nn.relu(aggcat @ w3 + b3)
    return (z @ w4 + b4).reshape(bs, M, DOUT)


# ----------------------------------- main ------------------------------------------
if __name__ == "__main__":
    key = jax.random.PRNGKey(0)
    keys = jax.random.split(key, 13)

    def init(k, shape, scale=0.1):
        return (scale * jax.random.normal(k, shape)).astype(jnp.float32)

    # deterministic synthetic parameters (shapes implied by the module's forward)
    wconv = init(keys[0], (CC, 2))                      # Conv2d(2, CC, 1) weight (squeezed)
    bconv = init(keys[1], (CC,))
    w1 = init(keys[2], (CC * UD + FL, H1))              # mlp1 layer 1 (layer_idx>1 input)
    b1 = init(keys[3], (H1,))
    w2 = init(keys[4], (H1, DEMB))                      # mlp1 layer 2
    b2 = init(keys[5], (DEMB,))
    w3 = init(keys[6], (F0 + FL + DEMB, H2))            # mlp2 layer 1
    b3 = init(keys[7], (H2,))
    w4 = init(keys[8], (H2, DOUT))                      # mlp2 layer 2
    b4 = init(keys[9], (DOUT,))
    params = (wconv, bconv, w1, b1, w2, b2, w3, b3, w4, b4)

    x0 = init(keys[10], (BS, M, F0), 1.0)
    x_last = init(keys[11], (BS, M, FL), 1.0)
    edge_attr = init(keys[12], (BS, E, F0), 1.0)

    # init-time constants: packed weight slab + static gather/aggregation matrices
    slab = pack_params(params)
    gmat, amat = build_topology(BS)   # whole batch in one block (1-TC v5e/v6e sweet spot)

    out = igconv_forward(x0, x_last, edge_attr, slab, gmat, amat)
    out = jax.block_until_ready(out)

    ref = igconv_reference(x0, x_last, edge_attr, params)
    np.testing.assert_allclose(np.asarray(out), np.asarray(ref), rtol=1e-4, atol=1e-4)

    print("KERNEL_OK")
</pallas_src>

<mosaic_0001>
module attributes {stable_mosaic.version = 11 : i64} {
  func.func @igconv_kernel(%arg0: i32, %arg1: memref<8x16xf32, #tpu.memory_space<vmem>>, %arg2: memref<8x16xf32, #tpu.memory_space<vmem>>, %arg3: memref<24x16xf32, #tpu.memory_space<vmem>>, %arg4: memref<24x8xf32, #tpu.memory_space<vmem>>, %arg5: memref<8x24xf32, #tpu.memory_space<vmem>>, %arg6: memref<288x64xf32, #tpu.memory_space<vmem>>, %arg7: memref<8x16xf32, #tpu.memory_space<vmem>>) attributes {dimension_semantics = [#tpu.dimension_semantics<parallel>], iteration_bounds = array<i64: 1>, scalar_prefetch = 0 : i64, scratch_operands = 0 : i64, tpu.core_type = #tpu.core_type<tc>, window_params = [{transform_indices = @transform_0, window_bounds = array<i64: 8, 16>}, {transform_indices = @transform_1, window_bounds = array<i64: 8, 16>}, {transform_indices = @transform_2, window_bounds = array<i64: 24, 16>}, {pipeline_mode = #tpu.pipeline_mode<synchronous>, transform_indices = @transform_3, window_bounds = array<i64: 24, 8>}, {pipeline_mode = #tpu.pipeline_mode<synchronous>, transform_indices = @transform_4, window_bounds = array<i64: 8, 24>}, {pipeline_mode = #tpu.pipeline_mode<synchronous>, transform_indices = @transform_5, window_bounds = array<i64: 288, 64>}, {transform_indices = @transform_6, window_bounds = array<i64: 8, 16>}]} {
    %c0 = arith.constant 0 : index
    %c0_0 = arith.constant 0 : index
    %0 = vector.load %arg1[%c0, %c0_0] : memref<8x16xf32, #tpu.memory_space<vmem>>, vector<8x16xf32>
    %c0_1 = arith.constant 0 : index
    %c0_2 = arith.constant 0 : index
    %1 = vector.load %arg2[%c0_1, %c0_2] : memref<8x16xf32, #tpu.memory_space<vmem>>, vector<8x16xf32>
    %c0_3 = arith.constant 0 : index
    %c0_4 = arith.constant 0 : index
    %2 = vector.load %arg3[%c0_3, %c0_4] : memref<24x16xf32, #tpu.memory_space<vmem>>, vector<24x16xf32>
    %c0_5 = arith.constant 0 : index
    %c0_6 = arith.constant 0 : index
    %3 = vector.load %arg4[%c0_5, %c0_6] : memref<24x8xf32, #tpu.memory_space<vmem>>, vector<24x8xf32>
    %c0_7 = arith.constant 0 : index
    %c0_8 = arith.constant 0 : index
    %4 = vector.load %arg5[%c0_7, %c0_8] : memref<8x24xf32, #tpu.memory_space<vmem>>, vector<8x24xf32>
    %c0_9 = arith.constant 0 : index
    %c0_10 = arith.constant 0 : index
    %5 = vector.load %arg6[%c0_9, %c0_10] : memref<288x64xf32, #tpu.memory_space<vmem>>, vector<1x64xf32>
    %c1 = arith.constant 1 : index
    %c0_11 = arith.constant 0 : index
    %6 = vector.load %arg6[%c1, %c0_11] : memref<288x64xf32, #tpu.memory_space<vmem>>, vector<1x64xf32>
    %c2 = arith.constant 2 : index
    %c0_12 = arith.constant 0 : index
    %7 = vector.load %arg6[%c2, %c0_12] : memref<288x64xf32, #tpu.memory_space<vmem>>, vector<1x64xf32>
    %c8 = arith.constant 8 : index
    %c0_13 = arith.constant 0 : index
    %8 = vector.load %arg6[%c8, %c0_13] : memref<288x64xf32, #tpu.memory_space<vmem>>, vector<80x64xf32>
    %c88 = arith.constant 88 : index
    %c0_14 = arith.constant 0 : index
    %9 = vector.load %arg6[%c88, %c0_14] : memref<288x64xf32, #tpu.memory_space<vmem>>, vector<64x32xf32>
    %c152 = arith.constant 152 : index
    %c0_15 = arith.constant 0 : index
    %10 = vector.load %arg6[%c152, %c0_15] : memref<288x64xf32, #tpu.memory_space<vmem>>, vector<64x64xf32>
    %c216 = arith.constant 216 : index
    %c0_16 = arith.constant 0 : index
    %11 = vector.load %arg6[%c216, %c0_16] : memref<288x64xf32, #tpu.memory_space<vmem>>, vector<64x16xf32>
    %c280 = arith.constant 280 : index
    %c0_17 = arith.constant 0 : index
    %12 = vector.load %arg6[%c280, %c0_17] : memref<288x64xf32, #tpu.memory_space<vmem>>, vector<1x64xf32>
    %c281 = arith.constant 281 : index
    %c0_18 = arith.constant 0 : index
    %13 = vector.load %arg6[%c281, %c0_18] : memref<288x64xf32, #tpu.memory_space<vmem>>, vector<1x32xf32>
    %c282 = arith.constant 282 : index
    %c0_19 = arith.constant 0 : index
    %14 = vector.load %arg6[%c282, %c0_19] : memref<288x64xf32, #tpu.memory_space<vmem>>, vector<1x64xf32>
    %c283 = arith.constant 283 : index
    %c0_20 = arith.constant 0 : index
    %15 = vector.load %arg6[%c283, %c0_20] : memref<288x64xf32, #tpu.memory_space<vmem>>, vector<1x16xf32>
    %cst = arith.constant dense<0.000000e+00> : vector<24x16xf32>
    %16 = tpu.matmul %3, %0, %cst {dimension_numbers = #tpu.dot_dimension_numbers<[1], [0], [0], [1], [0, 0, 1, 1], [], []>} : vector<24x8xf32>, vector<8x16xf32>, vector<24x16xf32> -> vector<24x16xf32>
    %cst_21 = arith.constant dense<0.000000e+00> : vector<24x16xf32>
    %17 = tpu.matmul %3, %1, %cst_21 {dimension_numbers = #tpu.dot_dimension_numbers<[1], [0], [0], [1], [0, 0, 1, 1], [], []>} : vector<24x8xf32>, vector<8x16xf32>, vector<24x16xf32> -> vector<24x16xf32>
    %18 = tpu.concatenate %16, %16, %16, %16 in 1 : vector<24x16xf32>, vector<24x16xf32>, vector<24x16xf32>, vector<24x16xf32> -> vector<24x64xf32>
    %19 = tpu.concatenate %2, %2, %2, %2 in 1 : vector<24x16xf32>, vector<24x16xf32>, vector<24x16xf32>, vector<24x16xf32> -> vector<24x64xf32>
    %20 = vector.broadcast %5 : vector<1x64xf32> to vector<24x64xf32>
    %21 = arith.mulf %20, %18 : vector<24x64xf32>
    %22 = vector.broadcast %6 : vector<1x64xf32> to vector<24x64xf32>
    %23 = arith.mulf %22, %19 : vector<24x64xf32>
    %24 = arith.addf %21, %23 : vector<24x64xf32>
    %25 = vector.broadcast %7 : vector<1x64xf32> to vector<24x64xf32>
    %26 = arith.addf %24, %25 : vector<24x64xf32>
    %cst_22 = arith.constant 0.000000e+00 : f32
    %27 = vector.broadcast %cst_22 : f32 to vector<24x64xf32>
    %28 = arith.maximumf %26, %27 : vector<24x64xf32>
    %29 = tpu.concatenate %28, %17 in 1 : vector<24x64xf32>, vector<24x16xf32> -> vector<24x80xf32>
    %cst_23 = arith.constant dense<0.000000e+00> : vector<24x64xf32>
    %30 = tpu.matmul %29, %8, %cst_23 {dimension_numbers = #tpu.dot_dimension_numbers<[1], [0], [0], [1], [0, 0, 1, 1], [], []>} : vector<24x80xf32>, vector<80x64xf32>, vector<24x64xf32> -> vector<24x64xf32>
    %31 = vector.broadcast %12 : vector<1x64xf32> to vector<24x64xf32>
    %32 = arith.addf %30, %31 : vector<24x64xf32>
    %cst_24 = arith.constant 0.000000e+00 : f32
    %33 = vector.broadcast %cst_24 : f32 to vector<24x64xf32>
    %34 = arith.maximumf %32, %33 : vector<24x64xf32>
    %cst_25 = arith.constant dense<0.000000e+00> : vector<24x32xf32>
    %35 = tpu.matmul %34, %9, %cst_25 {dimension_numbers = #tpu.dot_dimension_numbers<[1], [0], [0], [1], [0, 0, 1, 1], [], []>} : vector<24x64xf32>, vector<64x32xf32>, vector<24x32xf32> -> vector<24x32xf32>
    %36 = vector.broadcast %13 : vector<1x32xf32> to vector<24x32xf32>
    %37 = arith.addf %35, %36 : vector<24x32xf32>
    %cst_26 = arith.constant dense<0.000000e+00> : vector<8x32xf32>
    %38 = tpu.matmul %4, %37, %cst_26 {dimension_numbers = #tpu.dot_dimension_numbers<[1], [0], [0], [1], [0, 0, 1, 1], [], []>} : vector<8x24xf32>, vector<24x32xf32>, vector<8x32xf32> -> vector<8x32xf32>
    %39 = tpu.concatenate %0, %1, %38 in 1 : vector<8x16xf32>, vector<8x16xf32>, vector<8x32xf32> -> vector<8x64xf32>
    %cst_27 = arith.constant dense<0.000000e+00> : vector<8x64xf32>
    %40 = tpu.matmul %39, %10, %cst_27 {dimension_numbers = #tpu.dot_dimension_numbers<[1], [0], [0], [1], [0, 0, 1, 1], [], []>} : vector<8x64xf32>, vector<64x64xf32>, vector<8x64xf32> -> vector<8x64xf32>
    %41 = vector.broadcast %14 : vector<1x64xf32> to vector<8x64xf32>
    %42 = arith.addf %40, %41 : vector<8x64xf32>
    %cst_28 = arith.constant 0.000000e+00 : f32
    %43 = vector.broadcast %cst_28 : f32 to vector<8x64xf32>
    %44 = arith.maximumf %42, %43 : vector<8x64xf32>
    %cst_29 = arith.constant dense<0.000000e+00> : vector<8x16xf32>
    %45 = tpu.matmul %44, %11, %cst_29 {dimension_numbers = #tpu.dot_dimension_numbers<[1], [0], [0], [1], [0, 0, 1, 1], [], []>} : vector<8x64xf32>, vector<64x16xf32>, vector<8x16xf32> -> vector<8x16xf32>
    %46 = vector.broadcast %15 : vector<1x16xf32> to vector<8x16xf32>
    %47 = arith.addf %45, %46 : vector<8x16xf32>
    %c0_30 = arith.constant 0 : index
    %c0_31 = arith.constant 0 : index
    %48 = vector.load %arg7[%c0_30, %c0_31] : memref<8x16xf32, #tpu.memory_space<vmem>>, vector<8x16xf32>
    tpu.vector_store %arg7[%c0_30, %c0_31], %47 {strides = array<i32>} : memref<8x16xf32, #tpu.memory_space<vmem>>, vector<8x16xf32>,
    return
  }
  func.func @transform_0(%arg0: i32) -> (i32, i32) {
    %c0_i32 = arith.constant 0 : i32
    %c0_i32_0 = arith.constant 0 : i32
    return %arg0, %c0_i32 : i32, i32
  }
  func.func @transform_1(%arg0: i32) -> (i32, i32) {
    %c0_i32 = arith.constant 0 : i32
    %c0_i32_0 = arith.constant 0 : i32
    return %arg0, %c0_i32 : i32, i32
  }
  func.func @transform_2(%arg0: i32) -> (i32, i32) {
    %c0_i32 = arith.constant 0 : i32
    %c0_i32_0 = arith.constant 0 : i32
    return %arg0, %c0_i32 : i32, i32
  }
  func.func @transform_3(%arg0: i32) -> (i32, i32) {
    %c0_i32 = arith.constant 0 : i32
    %c0_i32_0 = arith.constant 0 : i32
    %c0_i32_1 = arith.constant 0 : i32
    return %c0_i32, %c0_i32_0 : i32, i32
  }
  func.func @transform_4(%arg0: i32) -> (i32, i32) {
    %c0_i32 = arith.constant 0 : i32
    %c0_i32_0 = arith.constant 0 : i32
    %c0_i32_1 = arith.constant 0 : i32
    return %c0_i32, %c0_i32_0 : i32, i32
  }
  func.func @transform_5(%arg0: i32) -> (i32, i32) {
    %c0_i32 = arith.constant 0 : i32
    %c0_i32_0 = arith.constant 0 : i32
    %c0_i32_1 = arith.constant 0 : i32
    return %c0_i32, %c0_i32_0 : i32, i32
  }
  func.func @transform_6(%arg0: i32) -> (i32, i32) {
    %c0_i32 = arith.constant 0 : i32
    %c0_i32_0 = arith.constant 0 : i32
    return %arg0, %c0_i32 : i32, i32
  }
}

</mosaic_0001>

<bundles_post_ra>
// kernel: tpu_custom_call.1
= control target key start
LH: loop header
LB: loop body
LE: loop exit
PB: predicated region body
PF: predicated region fallthrough
CT: control target
= control target key end

     0   :  { %vm74_vm0 = vcmask 64512   ;;  %v1097_v3 = vmov 0.0   ;;  %vm1098_vm1 = vmmov 0   ;;  %s1449_s0 = inlined_call_operand.vmem [shape: f32[8,16], index: 0, kind: input, shape index: {}]   ;;  %s1450_s1 = inlined_call_operand.vmem [shape: f32[8,16], index: 1, kind: input, shape index: {}]   ;;  %s1451_s2 = inlined_call_operand.vmem [shape: f32[24,16], index: 2, kind: input, shape index: {}]   ;;  %s1452_s3 = inlined_call_operand.vmem [shape: f32[24,8], index: 3, kind: input, shape index: {}]   ;;  %s1453_s4 = inlined_call_operand.vmem [shape: f32[8,24], index: 4, kind: input, shape index: {}]   ;;  %s1454_s5 = inlined_call_operand.vmem [shape: f32[288,64], index: 5, kind: input, shape index: {}]   ;;  %s1455_s6 = inlined_call_operand.hbm [shape: f32[8,16], index: 6, kind: output, shape index: {}]  }
   0x1   :  { %v1143_v0 = vld [vmem:[%s1449_s0] sm:$0xff]  ;;  %888 = vmatprep.subr.mxu0 %v1097_v3  ;;  %890 = vmatprep.mubr.msk.f32.mxu0 %vm1098_vm1, %v1097_v3 }
   0x2   :  { %v29_v1 = vld [vmem:[%s1452_s3] sm:$0xff]  ;;  %889 = vmatpush3.msra.mxu0 %v1143_v0  ;;  %899 = vmatprep.subr.mxu1 %v1097_v3 }
   0x3   :  { %v1151_v2 = vld [vmem:[%s1450_s1] sm:$0xff] }
   0x4   :  { %v1161_v4 = vld [vmem:[%s1451_s2] sm:$0xff] }
   0x5   :  { %11 = vsyncpa [#allocation3], 0  ;;  %891 = vmatmul.mubr.msk.f32.vlgmr.msra.gmra.mrb[0].mxu0 %vm74_vm0, %v29_v1  ;;  %900 = vmatpush3.msra.mxu1 %v1151_v2  ;;  %v30_v5 = vld [vmem:[%s1452_s3 + $0x8] sm:$0xff]  ;;  %s1099_s29 = smov 32   ;;  %s1100_s30 = smov 16   ;;  %v31_v6 = vld [vmem:[%s1452_s3 + $0x10] sm:$0xff] }
   0x6   :  { %901 = vmatprep.mubr.msk.f32.mxu1 %vm1098_vm1, %v1097_v3  ;;  %893 = vmatprep.mubr.msk.f32.mxu0 %vm1098_vm1, %v1097_v3  ;;  %s1101_s9 = smov 48   ;;  %v1193_v7 = vld [vmem:[%s1451_s2 + $0x8] sm:$0xff]  ;;  %v1102_v8 = vmov 0.0|0.0   ;;  %v37_v10 = vld [vmem:[%s1454_s5 + $0x10] sm:$0xff]  ;;  %v38_v11 = vld [vmem:[%s1454_s5 + $0x18] sm:$0xff]  ;;  %s1103_s10 = smov 64  }
   0x7   :  { %902 = vmatmul.mubr.msk.f32.vlgmr.msra.gmra.mrb[0].mxu1 %vm74_vm0, %v29_v1  ;;  %298 = vrot.lane.b32.xlu1 %v1161_v4, %s1099_s29  ;;  %v36_v9 = vld [vmem:[%s1454_s5 + $0x8] sm:$0xff]  ;;  %v39_v13 = vld [vmem:[%s1454_s5 + $0x20] sm:$0xff]  ;;  %v41_v16 = vld [vmem:[%s1454_s5 + $0x30] sm:$0xff]  ;;  %vm274_vm2 = vcmask 130048   ;;  %vm278_vm3 = vcmask 261120   ;;  %vm282_vm4 = vcmask 392192  }
   0x8   :  { %904 = vmatprep.mubr.msk.f32.mxu1 %vm1098_vm1, %v1097_v3  ;;  %289 = vrot.lane.b32.xlu0 %v1161_v4, %s1100_s30  ;;  %v1012_v12 = vpack.c.bf16 %v37_v10, %v36_v9  ;;  %v1015_v14 = vpack.c.bf16 %v39_v13, %v38_v11  ;;  %v40_v15 = vld [vmem:[%s1454_s5 + $0x28] sm:$0xff]  ;;  %v42_v18 = vld [vmem:[%s1454_s5 + $0x38] sm:$0xff]  ;;  %v43_v19 = vld [vmem:[%s1454_s5 + $0x40] sm:$0xff]  ;;  %vm364_vm5 = vcmask 523264   ;;  %vm372_vm6 = vcmask 654336   ;;  %s1104_s16 = smov [#allocation2]  }
   0x9   :  { %894 = vmatmul.mubr.msk.f32.gmra.mrb[2].mxu0 %vm74_vm0, %v30_v5  ;;  %1011 = vmatprep.subr.bf16.mxu0 %v1102_v8  ;;  %v1018_v17 = vpack.c.bf16 %v41_v16, %v40_v15  ;;  %v1021_v20 = vpack.c.bf16 %v43_v19, %v42_v18  ;;  %v44_v21 = vld [vmem:[%s1454_s5 + $0x48] sm:$0xff]  ;;  %v45_v22 = vld [vmem:[%s1454_s5 + $0x50] sm:$0xff]  ;;  %v46_v37 = vld [vmem:[%s1454_s5 + $0x58] sm:$0xff]  ;;  %vm558_vm7 = vcmask 195584  }
   0xa   :  { %896 = vmatprep.mubr.msk.f32.mxu0 %vm1098_vm1, %v1097_v3  ;;  %1026 = vmatprep.subr.bf16.mxu1 %v1102_v8  ;;  %v1024_v23 = vpack.c.bf16 %v45_v22, %v44_v21  ;;  %v1249_v27 = vld [vmem:[%s1451_s2 + $0x10] sm:$0xff]  ;;  %v47_v38 = vld [vmem:[%s1454_s5 + $0x60] sm:$0xff]  ;;  %v48_v39 = vld [vmem:[%s1454_s5 + $0x68] sm:$0xff] }
   0xb   :  { %905 = vmatmul.mubr.msk.f32.gmra.mrb[2].mxu1 %vm74_vm0, %v30_v5  ;;  %307 = vrot.lane.b32.xlu1 %v1161_v4, %s1101_s9  ;;  %v1027_v40 = vpack.c.bf16 %v47_v38, %v46_v37  ;;  %v49_v41 = vld [vmem:[%s1454_s5 + $0x70] sm:$0xff]  ;;  %v50_v43 = vld [vmem:[%s1454_s5 + $0x78] sm:$0xff]  ;;  %v51_v44 = vld [vmem:[%s1454_s5 + $0x80] sm:$0xff] }
   0xc   :  { %907 = vmatprep.mubr.msk.f32.mxu1 %vm1098_vm1, %v1097_v3  ;;  %1013 = vmatpush3.bf16.msra.mxu0 %v1012_v12  ;;  %v1030_v42 = vpack.c.bf16 %v49_v41, %v48_v39  ;;  %v1033_v45 = vpack.c.bf16 %v51_v44, %v50_v43  ;;  %v819_v57 = vld [vmem:[%s1454_s5 + $0x1] ss:$0 sm:$0xff]  ;;  %v818_v59 = vld [vmem:[%s1454_s5] ss:$0 sm:$0xff] }
   0xd   :  { %897 = vmatmul.mubr.msk.f32.gmra.mrb[4].mxu0 %vm74_vm0, %v31_v6  ;;  %1014 = vmatprep.subr.bf16.mxu0 %v1102_v8 }
   0xe   :  { %930 = vmatprep.mubr.msk.f32.mxu0 %vm1098_vm1, %v1097_v3  ;;  %1028 = vmatpush3.bf16.msra.mxu1 %v1027_v40 }
   0xf   :  { %908 = vmatmul.mubr.msk.f32.gmra.mrb[4].mxu1 %vm74_vm0, %v31_v6  ;;  %291 = vrot.lane.b32.xlu1 %v1193_v7, %s1100_s30 }
  0x10   :  { %955 = vmatprep.mubr.msk.f32.mxu1 %vm1098_vm1, %v1097_v3  ;;  %1016 = vmatpush3.bf16.msra.mxu0 %v1015_v14 }
  0x11   :  { %1017 = vmatprep.subr.bf16.mxu0 %v1102_v8  ;;  %1029 = vmatprep.subr.bf16.mxu1 %v1102_v8 }
  0x12   :  { %1031 = vmatpush3.bf16.msra.mxu1 %v1030_v42 }
  0x13   :  { %300 = vrot.lane.b32.xlu1 %v1193_v7, %s1099_s29  ;;  %1032 = vmatprep.subr.bf16.mxu1 %v1102_v8 }
  0x14   :  { %1019 = vmatpush3.bf16.msra.mxu0 %v1018_v17 }
  0x15   :  { %1020 = vmatprep.subr.bf16.mxu0 %v1102_v8 }
  0x16   :  { %1034 = vmatpush3.bf16.msra.mxu1 %v1033_v45  ;;  %v52_v45 = vld [vmem:[%s1454_s5 + $0x88] sm:$0xff] }
  0x17   :  { %309 = vrot.lane.b32.xlu1 %v1193_v7, %s1101_s9  ;;  %1035 = vmatprep.subr.bf16.mxu1 %v1102_v8 }
  0x18   :  { %1022 = vmatpush3.bf16.msra.mxu0 %v1021_v20 }
  0x19   :  { %1023 = vmatprep.subr.bf16.mxu0 %v1102_v8 }
  0x1c   :  { %1025 = vmatpush3.bf16.msra.mxu0 %v1024_v23 }
  0x1d   :  { %1041 = vmatprep.subr.bf16.mxu0 %v1102_v8 }
  0x79   :  { %v299_v46 = vpop.permute.xlu1 %298 }
  0x7a   :  { %v290_v50 = vpop.permute.xlu0 %289 }
  0x7b   :  { %v316_v52 = vsel %vm274_vm2, %v1161_v4, %v290_v50 }
  0x7c   :  { %v319_v53 = vsel %vm278_vm3, %v316_v52, %v299_v46  ;;  %v53_v46 = vld [vmem:[%s1454_s5 + $0x90] sm:$0xff] }
  0x7d   :  { %v308_v47 = vpop.permute.xlu1 %307 }
  0x7e   :  { %v322_v58 = vsel %vm282_vm4, %v319_v53, %v308_v47  ;;  %v1036_v47 = vpack.c.bf16 %v53_v46, %v52_v45 }
  0x7f   :  { %v336_v63 = vmul.f32 %v819_v57, %v322_v58 }
  0x80   :  { %1037 = vmatpush3.bf16.msra.mxu1 %v1036_v47 }
  0x81   :  { %v292_v48 = vpop.permute.xlu1 %291  ;;  %1038 = vmatprep.subr.bf16.mxu1 %v1102_v8 }
  0x82   :  { %v317_v12 = vsel %vm274_vm2, %v1193_v7, %v292_v48  ;;  %v821_v48 = vld [vmem:[%s1454_s5 + $0x118] ss:$0 sm:$0xff] }
  0x85   :  { %v301_v49 = vpop.permute.xlu1 %300 }
  0x86   :  { %v320_v15 = vsel %vm278_vm3, %v317_v12, %v301_v49  ;;  %v32_v12 = vld [vmem:[%s1453_s4] sm:$0xff] }
  0x89   :  { %v310_v51 = vpop.permute.xlu1 %309 }
  0x8a   :  { %v323_v17 = vsel %vm282_vm4, %v320_v15, %v310_v51  ;;  %v56_v15 = vld [vmem:[%s1454_s5 + $0xa8] sm:$0xff] }
  0x8b   :  { %v337_v22 = vmul.f32 %v819_v57, %v323_v17  ;;  %v57_v17 = vld [vmem:[%s1454_s5 + $0xb0] sm:$0xff] }
  0xd8   :  { %v150_v24 = vpop.f32.mrb[0].mxu0 }
  0xd9   :  { %256 = vrot.lane.b32.xlu1 %v150_v24, %s1099_s29  ;;  %247 = vrot.lane.b32.xlu0 %v150_v24, %s1100_s30  ;;  %v892_v25 = vpop.f32.mrb[1].mxu0 }
  0xda   :  { %v230_v26 = vpop.f32.mrb[0].mxu1 }
  0xdb   :  { %v903_v28 = vpop.f32.mrb[1].mxu1 }
  0xdc   :  { %v1251_v29 = vpop.f32.mrb[2].mxu0 }
  0xdd   :  { %265 = vrot.lane.b32.xlu0 %v150_v24, %s1101_s9  ;;  %v895_v30 = vpop.f32.mrb[3].mxu0  ;;  %293 = vrot.lane.b32.xlu1 %v1249_v27, %s1100_s30 }
  0xde   :  { %v235_v31 = vpop.f32.mrb[2].mxu1 }
  0xdf   :  { %v906_v32 = vpop.f32.mrb[3].mxu1 }
  0xe0   :  { %v1256_v33 = vpop.f32.mrb[4].mxu0 }
  0xe1   :  { %355 = vrot.lane.b32.xlu0 %v230_v26, %s1103_s10  ;;  %302 = vrot.lane.b32.xlu1 %v1249_v27, %s1099_s29  ;;  %v898_v34 = vpop.f32.mrb[5].mxu0 }
  0xe2   :  { %v240_v35 = vpop.f32.mrb[4].mxu1 }
  0xe3   :  { %v909_v36 = vpop.f32.mrb[5].mxu1 }
  0xe5   :  { %249 = vrot.lane.b32.xlu0 %v1251_v29, %s1100_s30  ;;  %269 = vrot.lane.b32.xlu1 %v1256_v33, %s1101_s9 }
  0xe9   :  { %258 = vrot.lane.b32.xlu0 %v1251_v29, %s1099_s29  ;;  %357 = vrot.lane.b32.xlu1 %v235_v31, %s1103_s10 }
  0xed   :  { %267 = vrot.lane.b32.xlu0 %v1251_v29, %s1101_s9  ;;  %633 = vrot.lane.b32.xlu1 %v1151_v2, %s1100_s30  ;;  %v820_v2 = vld [vmem:[%s1454_s5 + $0x2] ss:$0 sm:$0xff] }
  0xf1   :  { %251 = vrot.lane.b32.xlu0 %v1256_v33, %s1100_s30  ;;  %s804_s30 = sshll.u32 %s1104_s16, 4  ;;  %s805_s30 = int_to_ptr.vmem [resolvable:$true] %s804_s30 }
  0xf2   :  { %s1073_s17 = scalar_lea.vmem %s805_s30, 128  ;;  %p1078_p1 = scmp.lt.s32.totalorder %s805_s30, %s805_s30 }
  0xf3   :  { %p1074_p0 = scmp.ne.s32.totalorder %s805_s30, %s1073_s17  ;;  %p1079_p2 = scmp.lt.s32.totalorder %s1073_s17, %s1073_s17 }
  0xf5   :  { %260 = vrot.lane.b32.xlu0 %v1256_v33, %s1099_s29  ;;  %p1080_p3 = por %p1079_p2, %p1078_p1 }
  0xf7   :  { %p1081_p4 = pnand %p1080_p3, %p1074_p0 }
  0xf9   :  { %311 = vrot.lane.b32.xlu0 %v1249_v27, %s1101_s9 }
  0xfd   :  { %359 = vrot.lane.b32.xlu0 %v240_v35, %s1103_s10 }
 0x14b   :  { %v248_v54 = vpop.permute.xlu0 %247  ;;  %v257_v55 = vpop.permute.xlu1 %256 }
 0x14c   :  { %v275_v56 = vsel %vm274_vm2, %v150_v24, %v248_v54 }
 0x14d   :  { %v279_v60 = vsel %vm278_vm3, %v275_v56, %v257_v55 }
 0x14f   :  { %v266_v61 = vpop.permute.xlu0 %265  ;;  %v294_v6 = vpop.permute.xlu1 %293 }
 0x150   :  { %v283_v62 = vsel %vm282_vm4, %v279_v60, %v266_v61 }
 0x151   :  { %v329_v1 = vmul.f32 %v818_v59, %v283_v62 }
 0x153   :  { %v339_v4 = vadd.f32 %v336_v63, %v329_v1  ;;  %v356_v5 = vpop.permute.xlu0 %355  ;;  %v303_v14 = vpop.permute.xlu1 %302  ;;  %v825_v63 = vld [vmem:[%s1454_s5 + $0x119] ss:$0 sm:$0xff] }
 0x155   :  { %v346_v9 = vadd.f32 %v820_v2, %v339_v4 }
 0x157   :  { %v349_v10 = vmax.f32 %v346_v9, 0.0  ;;  %v250_v11 = vpop.permute.xlu0 %249  ;;  %v270_v21 = vpop.permute.xlu1 %269 }
 0x158   :  { %v276_v18 = vsel %vm274_vm2, %v1251_v29, %v250_v11  ;;  %v318_v29 = vsel %vm274_vm2, %v1249_v27, %v294_v6 }
 0x159   :  { %v365_v13 = vsel %vm364_vm5, %v349_v10, %v356_v5  ;;  %v321_v37 = vsel %vm278_vm3, %v318_v29, %v303_v14  ;;  %v55_v14 = vld [vmem:[%s1454_s5 + $0xa0] sm:$0xff] }
 0x15a   :  { %931 = vmatmul.mubr.msk.f32.vlgmr.msra.gmra.mrb[6].mxu0 %vm372_vm6, %v365_v13  ;;  %v54_v13 = vld [vmem:[%s1454_s5 + $0x98] sm:$0xff] }
 0x15b   :  { %v259_v16 = vpop.permute.xlu0 %258  ;;  %933 = vmatprep.mubr.msk.f32.mxu0 %vm1098_vm1, %v1097_v3  ;;  %v358_v28 = vpop.permute.xlu1 %357 }
 0x15c   :  { %v280_v19 = vsel %vm278_vm3, %v276_v18, %v259_v16  ;;  %v1042_v16 = vpack.c.bf16 %v55_v14, %v54_v13  ;;  %v1045_v18 = vpack.c.bf16 %v57_v17, %v56_v15 }
 0x15e   :  { %1043 = vmatpush3.bf16.msra.mxu0 %v1042_v16 }
 0x15f   :  { %v268_v20 = vpop.permute.xlu0 %267  ;;  %1044 = vmatprep.subr.bf16.mxu0 %v1102_v8 }
 0x160   :  { %v284_v7 = vsel %vm282_vm4, %v280_v19, %v268_v20  ;;  %v59_v19 = vld [vmem:[%s1454_s5 + $0xc0] sm:$0xff] }
 0x161   :  { %v330_v23 = vmul.f32 %v818_v59, %v284_v7  ;;  %v60_v7 = vld [vmem:[%s1454_s5 + $0xc8] sm:$0xff] }
 0x162   :  { %1046 = vmatpush3.bf16.msra.mxu0 %v1045_v18 }
 0x163   :  { %v340_v24 = vadd.f32 %v337_v22, %v330_v23  ;;  %v252_v25 = vpop.permute.xlu0 %251  ;;  %1047 = vmatprep.subr.bf16.mxu0 %v1102_v8  ;;  %v62_v23 = vld [vmem:[%s1454_s5 + $0xd8] sm:$0xff] }
 0x164   :  { %v277_v30 = vsel %vm274_vm2, %v1256_v33, %v252_v25  ;;  %v64_v25 = vld [vmem:[%s1454_s5 + $0xe8] sm:$0xff] }
 0x165   :  { %v347_v26 = vadd.f32 %v820_v2, %v340_v24  ;;  %v63_v24 = vld [vmem:[%s1454_s5 + $0xe0] sm:$0xff] }
 0x167   :  { %v261_v31 = vpop.permute.xlu0 %260  ;;  %v350_v32 = vmax.f32 %v347_v26, 0.0  ;;  %v1054_v26 = vpack.c.bf16 %v63_v24, %v62_v23 }
 0x168   :  { %v281_v34 = vsel %vm278_vm3, %v277_v30, %v261_v31  ;;  %v66_v31 = vld [vmem:[%s1454_s5 + $0xf8] sm:$0xff] }
 0x169   :  { %v366_v35 = vsel %vm364_vm5, %v350_v32, %v358_v28  ;;  %v285_v36 = vsel %vm282_vm4, %v281_v34, %v270_v21  ;;  %v61_v21 = vld [vmem:[%s1454_s5 + $0xd0] sm:$0xff]  ;;  %v67_v32 = vld [vmem:[%s1454_s5 + $0x100] sm:$0xff] }
 0x16a   :  { %934 = vmatmul.mubr.msk.f32.gmra.mrb[8].mxu0 %vm372_vm6, %v366_v35  ;;  %v331_v39 = vmul.f32 %v818_v59, %v285_v36  ;;  %v1051_v22 = vpack.c.bf16 %v61_v21, %v60_v7  ;;  %v65_v28 = vld [vmem:[%s1454_s5 + $0xf0] sm:$0xff]  ;;  %v1060_v29 = vpack.c.bf16 %v67_v32, %v66_v31  ;;  %v634_v36 = vpop.permute.xlu1 %633 }
 0x16b   :  { %v312_v38 = vpop.permute.xlu0 %311  ;;  %936 = vmatprep.mubr.msk.f32.mxu0 %vm1098_vm1, %v1097_v3  ;;  %v1057_v30 = vpack.c.bf16 %v65_v28, %v64_v25 }
 0x16c   :  { %v324_v33 = vsel %vm282_vm4, %v321_v37, %v312_v38  ;;  %v640_v37 = vsel %vm274_vm2, %v1143_v0, %v634_v36 }
 0x16d   :  { %v338_v40 = vmul.f32 %v819_v57, %v324_v33 }
 0x16f   :  { %v341_v41 = vadd.f32 %v338_v40, %v331_v39  ;;  %v360_v42 = vpop.permute.xlu0 %359  ;;  %v68_v39 = vld [vmem:[%s1454_s5 + $0x108] sm:$0xff]  ;;  %v69_v40 = vld [vmem:[%s1454_s5 + $0x110] sm:$0xff] }
 0x171   :  { %v348_v27 = vadd.f32 %v820_v2, %v341_v41  ;;  %v1063_v41 = vpack.c.bf16 %v69_v40, %v68_v39 }
 0x173   :  { %v351_v43 = vmax.f32 %v348_v27, 0.0 }
 0x175   :  { %v367_v44 = vsel %vm364_vm5, %v351_v43, %v360_v42 }
 0x176   :  { %937 = vmatmul.mubr.msk.f32.gmra.mrb[10].mxu0 %vm372_vm6, %v367_v44  ;;  %v832_v44 = vld [vmem:[%s1454_s5 + $0x11b] ss:$0 sm:$0xff] }
 0x177   :  { %989 = vmatprep.mubr.msk.f32.mxu0 %vm1098_vm1, %v1097_v3 }
 0x22d   :  { %v448_v49 = vpop.f32.mrb[6].mxu0 }
 0x22e   :  { %v449_v50 = vadd.f32 %v821_v48, %v448_v49  ;;  %v932_v51 = vpop.f32.mrb[7].mxu0 }
 0x230   :  { %v462_v52 = vmax.f32 %v449_v50, 0.0 }
 0x232   :  { %956 = vmatmul.mubr.msk.f32.vlgmr.msra.gmra.mrb[6].mxu1 %vm364_vm5, %v462_v52 }
 0x233   :  { %958 = vmatprep.mubr.msk.f32.mxu1 %vm1098_vm1, %v1097_v3 }
 0x23d   :  { %v453_v53 = vpop.f32.mrb[8].mxu0 }
 0x23e   :  { %v454_v54 = vadd.f32 %v821_v48, %v453_v53  ;;  %v935_v55 = vpop.f32.mrb[9].mxu0 }
 0x240   :  { %v463_v56 = vmax.f32 %v454_v54, 0.0 }
 0x242   :  { %959 = vmatmul.mubr.msk.f32.gmra.mrb[8].mxu1 %vm364_vm5, %v463_v56 }
 0x243   :  { %961 = vmatprep.mubr.msk.f32.mxu1 %vm1098_vm1, %v1097_v3 }
 0x249   :  { %v458_v57 = vpop.f32.mrb[10].mxu0 }
 0x24a   :  { %v459_v58 = vadd.f32 %v821_v48, %v458_v57  ;;  %v938_v59 = vpop.f32.mrb[11].mxu0 }
 0x24c   :  { %v464_v60 = vmax.f32 %v459_v58, 0.0 }
 0x24e   :  { %962 = vmatmul.mubr.msk.f32.gmra.mrb[10].mxu1 %vm364_vm5, %v464_v60 }
 0x24f   :  { %970 = vmatprep.mubr.msk.f32.mxu1 %vm1098_vm1, %v1097_v3 }
 0x305   :  { %v544_v61 = vpop.f32.mrb[6].mxu1 }
 0x306   :  { %v957_v62 = vpop.f32.mrb[7].mxu1  ;;  %v545_v2 = vadd.f32 %v825_v63, %v544_v61 }
 0x315   :  { %v549_v1 = vpop.f32.mrb[8].mxu1 }
 0x316   :  { %v550_v4 = vadd.f32 %v825_v63, %v549_v1  ;;  %v960_v5 = vpop.f32.mrb[9].mxu1 }
 0x318   :  { %v1039_v6 = vpack.c.bf16 %v550_v4, %v545_v2 }
 0x31a   :  { %1040 = vmatpush3.bf16.msra.mxu1 %v1039_v6 }
 0x31b   :  { %968 = vmatprep.subr.mxu1 %v1097_v3 }
 0x321   :  { %v554_v9 = vpop.f32.mrb[10].mxu1 }
 0x322   :  { %v555_v10 = vadd.f32 %v825_v63, %v554_v9  ;;  %v963_v11 = vpop.f32.mrb[11].mxu1 }
 0x324   :  { %969 = vmatpush3.msra.mxu1 %v555_v10 }
 0x325   :  { %971 = vmatmul.mubr.msk.f32.vlgmr.msra.gmra.mrb[12].mxu1 %vm558_vm7, %v32_v12  ;;  %1053 = vmatprep.subr.bf16.mxu1 %v1102_v8 }
 0x326   :  { %1008 = vmatprep.mubr.msk.f32.mxu1 %vm1098_vm1, %v1097_v3  ;;  %v58_v3 = vld [vmem:[%s1454_s5 + $0xb8] sm:$0xff]  ;;  %1055 = vmatpush3.bf16.msra.mxu1 %v1054_v26 }
 0x327   :  { %v1048_v20 = vpack.c.bf16 %v59_v19, %v58_v3  ;;  %1056 = vmatprep.subr.bf16.mxu1 %v1102_v8 }
 0x329   :  { %1049 = vmatpush3.bf16.msra.mxu0 %v1048_v20 }
 0x32a   :  { %1050 = vmatprep.subr.bf16.mxu0 %v1102_v8  ;;  %1058 = vmatpush3.bf16.msra.mxu1 %v1057_v30 }
 0x32b   :  { %1059 = vmatprep.subr.bf16.mxu1 %v1102_v8 }
 0x32d   :  { %1052 = vmatpush3.bf16.msra.mxu0 %v1051_v22 }
 0x32e   :  { %1061 = vmatpush3.bf16.msra.mxu1 %v1060_v29 }
 0x32f   :  { %1062 = vmatprep.subr.bf16.mxu1 %v1102_v8  ;;  %v830_v8 = vld [vmem:[%s1454_s5 + $0x11a] ss:$0 sm:$0xff] }
 0x332   :  { %1064 = vmatpush3.bf16.msra.mxu1 %v1063_v41 }
 0x3f8   :  { %v628_v34 = vpop.f32.mrb[12].mxu1 }
 0x3f9   :  { %637 = vrot.lane.b32.xlu0 %v628_v34, %s1099_s29  ;;  %v972_v35 = vpop.f32.mrb[13].mxu1 }
 0x46b   :  { %v638_v38 = vpop.permute.xlu0 %637 }
 0x46c   :  { %v641_v33 = vsel %vm278_vm3, %v640_v37, %v638_v38 }
 0x46d   :  { %990 = vmatmul.mubr.msk.f32.vlgmr.msra.gmra.mrb[12].mxu0 %vm364_vm5, %v641_v33 }
 0x540   :  { %v715_v0 = vpop.f32.mrb[12].mxu0 }
 0x541   :  { %v716_v27 = vadd.f32 %v830_v8, %v715_v0  ;;  %v991_v42 = vpop.f32.mrb[13].mxu0 }
 0x543   :  { %v719_v43 = vmax.f32 %v716_v27, 0.0 }
 0x545   :  { %1009 = vmatmul.mubr.msk.f32.vlgmr.msra.gmra.mrb[14].mxu1 %vm364_vm5, %v719_v43 }
 0x618   :  { %v793_v45 = vpop.f32.mrb[14].mxu1 }
 0x619   :  { %v794_v46 = vadd.f32 %v832_v44, %v793_v45  ;;  %v1010_v47 = vpop.f32.mrb[15].mxu1 }
 0x61b   :  { %797 = vst.msk [vmem:[#allocation2] sm:$0xff] %vm274_vm2, %v794_v46 }
 0x61c   :  { %1084 = shalt.err (!%p1081_p4)
}
 0x61d   :  { %s1085_s9 = scalar_lea.hbm %s1455_s6, 128 }
 0x61e   :  { %p1086_p5 = scmp.ne.s32.totalorder %s1455_s6, %s1085_s9  ;;  %p1089_p6 = scmp.lt.u32.totalorder %s1085_s9, %s1455_s6 }
 0x620   :  { %p1091_p7 = pnand %p1089_p6, %p1086_p5 }
 0x622   :  { %1094 = shalt.err (!%p1091_p7)
}
 0x623   :  { %807 = dma.vmem_to_hbm [thread:$0]  %s805_s30, 128, %s1455_s6, [#allocation3]  }
 0x624   :  { %1095 = dma.done.wait [#allocation3], 128  }
 0x625   :  { %1096 = vsyncadd [#allocation3], 4294967168 }
 0x626   :  { %811 = vsyncpa [#allocation3], 1 }

</bundles_post_ra>
